<compile_context>
chip_gen: v6e
topology: v6e:2x2x1
jax: 0.10.0
libtpu: 0.0.40
codegen_flags: <defaults>
</compile_context>

<pallas_src>
import jax
import jax.numpy as jnp
from jax.experimental import pallas as pl
from jax.experimental.pallas import tpu as pltpu


def _round_up(a, b):
    return ((a + b - 1) // b) * b


# ----------------------------------------------------------------------------
# Fused GraphConvolution kernel
# ----------------------------------------------------------------------------
def _gcn_kernel(adj_ref, x_ref, w_ref, b_ref, o_ref, acc_ref):
    # Grid: (row tiles [parallel], contraction tiles over N [arbitrary]).
    # acc[i_tile] = sum_k adj[i_tile, k_tile] @ x[k_tile]        (f32 scratch)
    # out[i_tile] = acc[i_tile] @ W + b                          (last k step)
    k = pl.program_id(1)

    @pl.when(k == 0)
    def _init():
        acc_ref[...] = jnp.zeros_like(acc_ref)

    acc_ref[...] += jnp.dot(
        adj_ref[...], x_ref[...], preferred_element_type=jnp.float32
    )

    @pl.when(k == pl.num_programs(1) - 1)
    def _finalize():
        o_ref[...] = (
            jnp.dot(acc_ref[...], w_ref[...], preferred_element_type=jnp.float32)
            + b_ref[...]
        ).astype(o_ref.dtype)


def graph_convolution(x, adj, weight, bias=None):
    """GraphConvolution forward:  adj @ (x @ weight) + bias.

    x:      (N, K)  node features
    adj:    (N, N)  (dense) adjacency
    weight: (K, F)
    bias:   (F,) or None
    returns (N, F) float32
    """
    N, K = x.shape
    Kw, F = weight.shape
    assert Kw == K and adj.shape == (N, N)

    x = x.astype(jnp.float32)
    adj = adj.astype(jnp.float32)
    weight = weight.astype(jnp.float32)
    if bias is None:
        bias = jnp.zeros((F,), jnp.float32)
    bias2d = jnp.asarray(bias, jnp.float32).reshape(1, F)

    # ---- Tiling ------------------------------------------------------------
    # Pad the node dim to a multiple of 128 so both the row tiling and the
    # contraction tiling satisfy the (8, 128) block rule without masking.
    Np = _round_up(N, 128)
    tile_n = next(t for t in (256, 128) if Np % t == 0)          # output rows
    tile_k = next(t for t in (512, 384, 256, 128) if Np % t == 0)  # contraction

    if Np != N:
        pad = Np - N
        adj = jnp.pad(adj, ((0, pad), (0, pad)))
        x = jnp.pad(x, ((0, pad), (0, 0)))

    grid = (Np // tile_n, Np // tile_k)

    cost = pl.CostEstimate(
        flops=2 * Np * Np * K + 2 * Np * K * F,
        transcendentals=0,
        bytes_accessed=4 * (Np * Np + Np * K + K * F + F + Np * F),
    )

    out = pl.pallas_call(
        _gcn_kernel,
        out_shape=jax.ShapeDtypeStruct((Np, F), jnp.float32),
        grid=grid,
        in_specs=[
            pl.BlockSpec((tile_n, tile_k), lambda i, k: (i, k)),  # adj: streamed
            pl.BlockSpec((tile_k, K), lambda i, k: (k, 0)),       # x: streamed over k
            pl.BlockSpec((K, F), lambda i, k: (0, 0)),            # weight: resident
            pl.BlockSpec((1, F), lambda i, k: (0, 0)),            # bias: resident
        ],
        out_specs=pl.BlockSpec((tile_n, F), lambda i, k: (i, 0)),
        scratch_shapes=[pltpu.VMEM((tile_n, K), jnp.float32)],
        compiler_params=pltpu.CompilerParams(
            dimension_semantics=("parallel", "arbitrary"),
        ),
        cost_estimate=cost,
    )(adj, x, weight, bias2d)

    return out[:N] if Np != N else out


# ----------------------------------------------------------------------------
if __name__ == "__main__":
    # Small shapes consistent with the module (N nodes, K=in_features,
    # F=out_features). N=600 is deliberately NOT a multiple of 128 so the
    # padding path, the multi-tile row axis, and the multi-step contraction
    # accumulator are all exercised.
    N, K, F = 600, 64, 128

    key = jax.random.PRNGKey(0)
    k_adj, k_x, k_w, k_b = jax.random.split(key, 4)

    # Deterministic row-normalised random adjacency (dense stand-in for spmm).
    adj_raw = jax.random.uniform(k_adj, (N, N), jnp.float32, 0.0, 1.0)
    adj = adj_raw / jnp.sum(adj_raw, axis=1, keepdims=True)

    x = jax.random.normal(k_x, (N, K), jnp.float32)

    # Matches reset_parameters(): stdv = 1/sqrt(out_features), U(-stdv, stdv).
    stdv = 1.0 / (F ** 0.5)
    weight = jax.random.uniform(k_w, (K, F), jnp.float32, -stdv, stdv)
    bias = jax.random.uniform(k_b, (F,), jnp.float32, -stdv, stdv)

    fwd = jax.jit(graph_convolution)
    out = jax.block_until_ready(fwd(x, adj, weight, bias))

    # Pure-JAX reference in the exact torch order: adj @ (x @ W) + b.
    ref = adj @ (x @ weight) + bias

    assert out.shape == (N, F)
    assert bool(jnp.all(jnp.isfinite(out)))
    assert bool(jnp.allclose(out, ref, rtol=1e-4, atol=1e-4))
    print("KERNEL_OK")
</pallas_src>

<mosaic_0001>
module attributes {stable_mosaic.version = 11 : i64} {
  func.func @_gcn_kernel(%arg0: i32, %arg1: i32, %arg2: memref<128x128xf32, #tpu.memory_space<vmem>>, %arg3: memref<128x64xf32, #tpu.memory_space<vmem>>, %arg4: memref<64x128xf32, #tpu.memory_space<vmem>>, %arg5: memref<1x128xf32, #tpu.memory_space<vmem>>, %arg6: memref<128x128xf32, #tpu.memory_space<vmem>>, %arg7: memref<128x64xf32, #tpu.memory_space<vmem>>) attributes {dimension_semantics = [#tpu.dimension_semantics<parallel>, #tpu.dimension_semantics<arbitrary>], iteration_bounds = array<i64: 5, 5>, scalar_prefetch = 0 : i64, scratch_operands = 1 : i64, tpu.core_type = #tpu.core_type<tc>, window_params = [{transform_indices = @transform_0, window_bounds = array<i64: 128, 128>}, {transform_indices = @transform_1, window_bounds = array<i64: 128, 64>}, {pipeline_mode = #tpu.pipeline_mode<synchronous>, transform_indices = @transform_2, window_bounds = array<i64: 64, 128>}, {pipeline_mode = #tpu.pipeline_mode<synchronous>, transform_indices = @transform_3, window_bounds = array<i64: 1, 128>}, {transform_indices = @transform_4, window_bounds = array<i64: 128, 128>}]} {
    %c0_i32 = arith.constant 0 : i32
    %0 = arith.cmpi eq, %arg1, %c0_i32 : i32
    %1 = arith.extui %0 : i1 to i32
    %c0_i32_0 = arith.constant 0 : i32
    %2 = arith.cmpi ne, %1, %c0_i32_0 : i32
    scf.if %2 {
      %cst_9 = arith.constant 0.000000e+00 : f32
      %12 = vector.broadcast %cst_9 : f32 to vector<128x64xf32>
      %c0_10 = arith.constant 0 : index
      %c0_11 = arith.constant 0 : index
      %13 = vector.load %arg7[%c0_10, %c0_11] : memref<128x64xf32, #tpu.memory_space<vmem>>, vector<128x64xf32>
      tpu.vector_store %arg7[%c0_10, %c0_11], %12 {strides = array<i32>} : memref<128x64xf32, #tpu.memory_space<vmem>>, vector<128x64xf32>,
    } else {
    }
    %c0 = arith.constant 0 : index
    %c0_1 = arith.constant 0 : index
    %3 = vector.load %arg7[%c0, %c0_1] : memref<128x64xf32, #tpu.memory_space<vmem>>, vector<128x64xf32>
    %c0_2 = arith.constant 0 : index
    %c0_3 = arith.constant 0 : index
    %4 = vector.load %arg2[%c0_2, %c0_3] : memref<128x128xf32, #tpu.memory_space<vmem>>, vector<128x128xf32>
    %c0_4 = arith.constant 0 : index
    %c0_5 = arith.constant 0 : index
    %5 = vector.load %arg3[%c0_4, %c0_5] : memref<128x64xf32, #tpu.memory_space<vmem>>, vector<128x64xf32>
    %cst = arith.constant dense<0.000000e+00> : vector<128x64xf32>
    %6 = tpu.matmul %4, %5, %cst {dimension_numbers = #tpu.dot_dimension_numbers<[1], [0], [0], [1], [0, 0, 1, 1], [], []>} : vector<128x128xf32>, vector<128x64xf32>, vector<128x64xf32> -> vector<128x64xf32>
    %7 = arith.addf %3, %6 : vector<128x64xf32>
    %c0_6 = arith.constant 0 : index
    %c0_7 = arith.constant 0 : index
    %8 = vector.load %arg7[%c0_6, %c0_7] : memref<128x64xf32, #tpu.memory_space<vmem>>, vector<128x64xf32>
    tpu.vector_store %arg7[%c0_6, %c0_7], %7 {strides = array<i32>} : memref<128x64xf32, #tpu.memory_space<vmem>>, vector<128x64xf32>,
    %c4_i32 = arith.constant 4 : i32
    %9 = arith.cmpi eq, %arg1, %c4_i32 : i32
    %10 = arith.extui %9 : i1 to i32
    %c0_i32_8 = arith.constant 0 : i32
    %11 = arith.cmpi ne, %10, %c0_i32_8 : i32
    scf.if %11 {
      %c0_9 = arith.constant 0 : index
      %c0_10 = arith.constant 0 : index
      %12 = vector.load %arg7[%c0_9, %c0_10] : memref<128x64xf32, #tpu.memory_space<vmem>>, vector<128x64xf32>
      %c0_11 = arith.constant 0 : index
      %c0_12 = arith.constant 0 : index
      %13 = vector.load %arg4[%c0_11, %c0_12] : memref<64x128xf32, #tpu.memory_space<vmem>>, vector<64x128xf32>
      %cst_13 = arith.constant dense<0.000000e+00> : vector<128x128xf32>
      %14 = tpu.matmul %12, %13, %cst_13 {dimension_numbers = #tpu.dot_dimension_numbers<[1], [0], [0], [1], [0, 0, 1, 1], [], []>} : vector<128x64xf32>, vector<64x128xf32>, vector<128x128xf32> -> vector<128x128xf32>
      %c0_14 = arith.constant 0 : index
      %c0_15 = arith.constant 0 : index
      %15 = vector.load %arg5[%c0_14, %c0_15] : memref<1x128xf32, #tpu.memory_space<vmem>>, vector<1x128xf32>
      %16 = vector.broadcast %15 : vector<1x128xf32> to vector<128x128xf32>
      %17 = arith.addf %14, %16 : vector<128x128xf32>
      %c0_16 = arith.constant 0 : index
      %c0_17 = arith.constant 0 : index
      %18 = vector.load %arg6[%c0_16, %c0_17] : memref<128x128xf32, #tpu.memory_space<vmem>>, vector<128x128xf32>
      tpu.vector_store %arg6[%c0_16, %c0_17], %17 {strides = array<i32>} : memref<128x128xf32, #tpu.memory_space<vmem>>, vector<128x128xf32>,
    } else {
    }
    return
  }
  func.func @transform_0(%arg0: i32, %arg1: i32) -> (i32, i32) {
    %c0_i32 = arith.constant 0 : i32
    return %arg0, %arg1 : i32, i32
  }
  func.func @transform_1(%arg0: i32, %arg1: i32) -> (i32, i32) {
    %c0_i32 = arith.constant 0 : i32
    %c0_i32_0 = arith.constant 0 : i32
    return %arg1, %c0_i32 : i32, i32
  }
  func.func @transform_2(%arg0: i32, %arg1: i32) -> (i32, i32) {
    %c0_i32 = arith.constant 0 : i32
    %c0_i32_0 = arith.constant 0 : i32
    %c0_i32_1 = arith.constant 0 : i32
    return %c0_i32, %c0_i32_0 : i32, i32
  }
  func.func @transform_3(%arg0: i32, %arg1: i32) -> (i32, i32) {
    %c0_i32 = arith.constant 0 : i32
    %c0_i32_0 = arith.constant 0 : i32
    %c0_i32_1 = arith.constant 0 : i32
    return %c0_i32, %c0_i32_0 : i32, i32
  }
  func.func @transform_4(%arg0: i32, %arg1: i32) -> (i32, i32) {
    %c0_i32 = arith.constant 0 : i32
    %c0_i32_0 = arith.constant 0 : i32
    return %arg0, %c0_i32 : i32, i32
  }
}

</mosaic_0001>

<bundles_post_ra>
// kernel: graph_convolution.1
= control target key start
LH: loop header
LB: loop body
LE: loop exit
PB: predicated region body
PF: predicated region fallthrough
CT: control target
= control target key end

     0   :  { %s1288_s15 = smov 0   ;;  %s1290_s16 = smov 0   ;;  %s1529_s0 = inlined_call_operand.vmem [shape: f32[640,640], index: 0, kind: input, shape index: {}]   ;;  %s1530_s1 = inlined_call_operand.vmem [shape: f32[640,64], index: 1, kind: input, shape index: {}]   ;;  %s1531_s2 = inlined_call_operand.vmem [shape: f32[64,128], index: 2, kind: input, shape index: {}]   ;;  %s1532_s3 = inlined_call_operand.vmem [shape: f32[1,128], index: 3, kind: input, shape index: {}]   ;;  %s1533_s4 = inlined_call_operand.vmem [shape: f32[640,128], index: 4, kind: output, shape index: {}]  }
   0x1   :  { %s1292_s17 = smov 0   ;;  %s1294_s18 = smov 0  }
   0x2   :  { %s1296_s19 = smov 0   ;;  %s1298_s20 = smov 0  }
   0x3   :  { %s1300_s21 = smov 0  }
   0x4 LB: > { %s23_s22 = sadd.s32 1, %s1252_s19  ;;  %s26_s23 = sadd.s32 1, %s1256_s20  ;;  %s1260_s21 = sphi %s1300_s21, %s14_s21   ;;  %s1256_s20 = sphi %s1298_s20, %s1539_s20   ;;  %s1252_s19 = sphi %s1296_s19, %s1538_s19   ;;  %s1248_s18 = sphi %s1294_s18, %s1537_s18   ;;  %s1244_s17 = sphi %s1292_s17, %s1536_s17   ;;  %s1240_s16 = sphi %s1290_s16, %s1535_s16   ;;  %s1236_s15 = sphi %s1288_s15, %s1534_s15  }
   0x5   : > { %p24_p0 = scmp.ge.s32.totalorder %s23_s22, 5  ;;  %p42_p1 = scmp.ne.s32.totalorder %s1240_s16, %s1236_s15 }
   0x6   : > { %p43_p2 = scmp.eq.s32.totalorder %s1260_s21, 0  ;;  %s35_s27 = sadd.s32 1, %s1240_s16 }
   0x7   : > { %s1541_s22 = smov (%p24_p0, %s23_s22), 0  ;;  %s1543_s23 = smov (!%p24_p0, %s26_s23), %s1256_s20 }
   0x8   : > { %p44_p3 = por %p43_p2, %p42_p1  ;;  %p28_p4 = scmp.ge.s32.totalorder %s1543_s23, 5 }
   0x9   : > { %s31_s24 = ssub.s32 %s1252_s19, %s1541_s22  ;;  %p916_p6 = scmp.ge.s32.totalorder %s1260_s21, 25 }
   0xa   : > { %s1545_s23 = smov (%p28_p4, %s1543_s23), 0 }
   0xb   : > { %s30_s25 = ssub.s32 %s1256_s20, %s1545_s23  ;;  %168 = sbr.rel (%p916_p6) target bundleno = 31 (0x1f), region = 24 }
   0xc   : > { %s32_s26 = sor.u32 %s31_s24, %s30_s25 }
   0xd   : > { %p33_p5 = scmp.eq.s32.totalorder %s32_s26, 0 }
   0xf   : > { %s1339_s28 = scalar_select %p33_p5, %s1240_s16, %s35_s27  }
  0x10   : > { %171 = sbr.rel (!%p44_p3) target bundleno = 31 (0x1f), region = 28  ;;  %s173_s29 = sand.u32 (%p44_p3), 1, %s1240_s16  }
  0x11   : > { %s1148_s30 = smul.u32 (%p44_p3), 80, %s1256_s20  ;;  %s917_s5 = sshll.u32 (%p44_p3), %s173_s29, 7 }
  0x12   : > { %s175_s11 = scalar_lea.vmem (%p44_p3), [#allocation3], %s917_s5 }
  0x13   : > { %s178_s6 = sadd.s32 (%p44_p3), %s1252_s19, %s1148_s30 }
  0x14   : > { %s920_s7 = sshll.u32 (%p44_p3), %s178_s6, 3 }
  0x15   : > { %s1348_s10 = scalar_lea.vmem %s1529_s0, %s920_s7 }
  0x16   : > { %v239_v0 = vld [vmem:[%s1348_s10] sm:$0xff]  ;;  %v241_v1 = vld [vmem:[%s1348_s10 + $0x28] sm:$0xff]  ;;  %v243_v2 = vld [vmem:[%s1348_s10 + $0x50] sm:$0xff] }
  0x17   : > { %240 = vst [vmem:[%s175_s11] sm:$0xff] %v239_v0  ;;  %242 = vst [vmem:[%s175_s11 + $0x8] sm:$0xff] %v241_v1  ;;  %v245_v3 = vld [vmem:[%s1348_s10 + $0x78] sm:$0xff]  ;;  %v247_v4 = vld [vmem:[%s1348_s10 + $0xa0] sm:$0xff] }
  0x18   : > { %244 = vst [vmem:[%s175_s11 + $0x10] sm:$0xff] %v243_v2  ;;  %v249_v5 = vld [vmem:[%s1348_s10 + $0xc8] sm:$0xff]  ;;  %246 = vst [vmem:[%s175_s11 + $0x18] sm:$0xff] %v245_v3  ;;  %v251_v6 = vld [vmem:[%s1348_s10 + $0xf0] sm:$0xff] }
  0x19   : > { %248 = vst [vmem:[%s175_s11 + $0x20] sm:$0xff] %v247_v4  ;;  %250 = vst [vmem:[%s175_s11 + $0x28] sm:$0xff] %v249_v5  ;;  %v253_v7 = vld [vmem:[%s1348_s10 + $0x118] sm:$0xff]  ;;  %v255_v8 = vld [vmem:[%s1348_s10 + $0x140] sm:$0xff] }
  0x1a   : > { %252 = vst [vmem:[%s175_s11 + $0x30] sm:$0xff] %v251_v6  ;;  %254 = vst [vmem:[%s175_s11 + $0x38] sm:$0xff] %v253_v7  ;;  %v257_v9 = vld [vmem:[%s1348_s10 + $0x168] sm:$0xff]  ;;  %v259_v10 = vld [vmem:[%s1348_s10 + $0x190] sm:$0xff] }
  0x1b   : > { %256 = vst [vmem:[%s175_s11 + $0x40] sm:$0xff] %v255_v8  ;;  %v261_v11 = vld [vmem:[%s1348_s10 + $0x1b8] sm:$0xff]  ;;  %258 = vst [vmem:[%s175_s11 + $0x48] sm:$0xff] %v257_v9  ;;  %v263_v12 = vld [vmem:[%s1348_s10 + $0x1e0] sm:$0xff] }
  0x1c   : > { %260 = vst [vmem:[%s175_s11 + $0x50] sm:$0xff] %v259_v10  ;;  %262 = vst [vmem:[%s175_s11 + $0x58] sm:$0xff] %v261_v11  ;;  %v265_v13 = vld [vmem:[%s1348_s10 + $0x208] sm:$0xff]  ;;  %v267_v14 = vld [vmem:[%s1348_s10 + $0x230] sm:$0xff] }
  0x1d   : > { %264 = vst [vmem:[%s175_s11 + $0x60] sm:$0xff] %v263_v12  ;;  %266 = vst [vmem:[%s175_s11 + $0x68] sm:$0xff] %v265_v13  ;;  %v269_v15 = vld [vmem:[%s1348_s10 + $0x258] sm:$0xff] }
  0x1e   : > { %268 = vst [vmem:[%s175_s11 + $0x70] sm:$0xff] %v267_v14  ;;  %270 = vst [vmem:[%s175_s11 + $0x78] sm:$0xff] %v269_v15 }
  0x1f PF: > { %p921_p7 = scmp.ge.s32.totalorder %s1260_s21, 1  ;;  %p284_p8 = scmp.lt.s32.totalorder %s1260_s21, 26 }
  0x21   : > { %p285_p9 = pnand %p921_p7, %p284_p8 }
  0x22   : > { %s291_s12 = sand.u32 (!%p285_p9), 1, %s1236_s15   ;;  %s923_s13 = sshll.u32 (!%p285_p9), %s1244_s17, 4 }
  0x23   : > { %288 = sbr.rel (%p285_p9) target bundleno = 529 (0x211), region = 70  ;;  %s922_s14 = sshll.u32 (!%p285_p9), %s291_s12, 7 }
  0x24   : > { %p323_p10 = scmp.lt.s32.totalorder (!%p285_p9), %s923_s13, 79  ;;  %s925_s24 = sshll.u32 (!%p285_p9), %s1248_s18, 4 }
  0x25   : > { %p329_p11 = scmp.lt.s32.totalorder (!%p285_p9), %s925_s24, 79  ;;  %s1381_s15 = scalar_lea.vmem (!%p285_p9), [#allocation3], %s922_s14 }
  0x26   : > { %p927_p12 = scmp.ne.s32.totalorder (!%p285_p9), %s1244_s17, 0 }
  0x28   : > { %s1547_s13 = smov (!%p323_p10, %s923_s13), 79  ;;  %s1549_s24 = smov (!%p329_p11, %s925_s24), 79 }
  0x29   : > { %s924_s25 = sshll.u32 %s1547_s13, 3  ;;  %s926_s30 = sshll.u32 %s1549_s24, 3 }
  0x2a   : > { %s1374_s29 = scalar_lea.vmem %s1530_s1, %s924_s25  ;;  %s1379_s7 = scalar_lea.vmem %s1533_s4, %s926_s30 }
  0x2b   : > { %337 = sbr.rel (%p927_p12) target bundleno = 57 (0x39), region = 78 }
  0x30   : > { %vm338_vm0 = vcmask 523264   ;;  %v1262_v16 = vmov 0.0  }
  0x31   : > { %339 = vst.msk [vmem:[#allocation2] sm:$0xff] %vm338_vm0, %v1262_v16  ;;  %340 = vst.msk [vmem:[#allocation2 + $0x8] sm:$0xff] %vm338_vm0, %v1262_v16 }
  0x32   : > { %341 = vst.msk [vmem:[#allocation2 + $0x10] sm:$0xff] %vm338_vm0, %v1262_v16  ;;  %342 = vst.msk [vmem:[#allocation2 + $0x18] sm:$0xff] %vm338_vm0, %v1262_v16 }
  0x33   : > { %343 = vst.msk [vmem:[#allocation2 + $0x20] sm:$0xff] %vm338_vm0, %v1262_v16  ;;  %344 = vst.msk [vmem:[#allocation2 + $0x28] sm:$0xff] %vm338_vm0, %v1262_v16 }
  0x34   : > { %345 = vst.msk [vmem:[#allocation2 + $0x30] sm:$0xff] %vm338_vm0, %v1262_v16  ;;  %346 = vst.msk [vmem:[#allocation2 + $0x38] sm:$0xff] %vm338_vm0, %v1262_v16 }
  0x35   : > { %347 = vst.msk [vmem:[#allocation2 + $0x40] sm:$0xff] %vm338_vm0, %v1262_v16  ;;  %348 = vst.msk [vmem:[#allocation2 + $0x48] sm:$0xff] %vm338_vm0, %v1262_v16 }
  0x36   : > { %349 = vst.msk [vmem:[#allocation2 + $0x50] sm:$0xff] %vm338_vm0, %v1262_v16  ;;  %350 = vst.msk [vmem:[#allocation2 + $0x58] sm:$0xff] %vm338_vm0, %v1262_v16 }
  0x37   : > { %351 = vst.msk [vmem:[#allocation2 + $0x60] sm:$0xff] %vm338_vm0, %v1262_v16  ;;  %352 = vst.msk [vmem:[#allocation2 + $0x68] sm:$0xff] %vm338_vm0, %v1262_v16 }
  0x38   : > { %353 = vst.msk [vmem:[#allocation2 + $0x70] sm:$0xff] %vm338_vm0, %v1262_v16  ;;  %354 = vst.msk [vmem:[#allocation2 + $0x78] sm:$0xff] %vm338_vm0, %v1262_v16 }
  0x39 PF: > { %v402_v17 = vld [vmem:[%s1374_s29 + $0x78] sm:$0xff]  ;;  %v401_v18 = vld [vmem:[%s1374_s29 + $0x70] sm:$0xff]  ;;  %v400_v19 = vld [vmem:[%s1374_s29 + $0x68] sm:$0xff]  ;;  %vm564_vm1 = vcmask 523264   ;;  %p928_p13 = scmp.ne.s32.totalorder %s1244_s17, 4 }
  0x3a   : > { %1004 = vmatprep.subr.mxu0 %v402_v17  ;;  %1100 = vmatprep.subr.mxu1 %v402_v17  ;;  %v399_v20 = vld [vmem:[%s1374_s29 + $0x60] sm:$0xff]  ;;  %v398_v21 = vld [vmem:[%s1374_s29 + $0x58] sm:$0xff]  ;;  %v397_v22 = vld [vmem:[%s1374_s29 + $0x50] sm:$0xff] }
  0x3b   : > { %1005 = vmatpush3.msra.mxu0 %v402_v17  ;;  %1116 = vmatpush3.msra.mxu1 %v402_v17  ;;  %v396_v23 = vld [vmem:[%s1374_s29 + $0x48] sm:$0xff]  ;;  %v395_v24 = vld [vmem:[%s1374_s29 + $0x40] sm:$0xff]  ;;  %v394_v25 = vld [vmem:[%s1374_s29 + $0x38] sm:$0xff] }
  0x3c   : > { %1006 = vmatprep.subr.mxu0 %v401_v18  ;;  %1101 = vmatprep.subr.mxu1 %v401_v18  ;;  %v393_v26 = vld [vmem:[%s1374_s29 + $0x30] sm:$0xff]  ;;  %v392_v27 = vld [vmem:[%s1374_s29 + $0x28] sm:$0xff]  ;;  %v391_v28 = vld [vmem:[%s1374_s29 + $0x20] sm:$0xff] }
  0x3d   : > { %1007 = vmatpush3.msra.mxu0 %v401_v18  ;;  %1117 = vmatpush3.msra.mxu1 %v401_v18  ;;  %v390_v29 = vld [vmem:[%s1374_s29 + $0x18] sm:$0xff]  ;;  %v389_v30 = vld [vmem:[%s1374_s29 + $0x10] sm:$0xff]  ;;  %v388_v31 = vld [vmem:[%s1374_s29 + $0x8] sm:$0xff] }
  0x3e   : > { %1008 = vmatprep.subr.mxu0 %v400_v19  ;;  %1102 = vmatprep.subr.mxu1 %v400_v19  ;;  %v387_v32 = vld [vmem:[%s1374_s29] sm:$0xff]  ;;  %v372_v35 = vld [vmem:[%s1381_s15 + $0x8] sm:$0xff]  ;;  %v373_v37 = vld [vmem:[%s1381_s15 + $0x10] sm:$0xff] }
  0x3f   : > { %1009 = vmatpush3.msra.mxu0 %v400_v19  ;;  %1118 = vmatpush3.msra.mxu1 %v400_v19  ;;  %v371_v33 = vld [vmem:[%s1381_s15] sm:$0xff]  ;;  %v380_v36 = vld [vmem:[%s1381_s15 + $0x48] sm:$0xff]  ;;  %v381_v38 = vld [vmem:[%s1381_s15 + $0x50] sm:$0xff] }
  0x40   : > { %1010 = vmatprep.subr.mxu0 %v399_v20  ;;  %1103 = vmatprep.subr.mxu1 %v399_v20  ;;  %v379_v34 = vld [vmem:[%s1381_s15 + $0x40] sm:$0xff]  ;;  %v374_v39 = vld [vmem:[%s1381_s15 + $0x18] sm:$0xff]  ;;  %v376_v43 = vld [vmem:[%s1381_s15 + $0x28] sm:$0xff] }
  0x41   : > { %1011 = vmatpush3.msra.mxu0 %v399_v20  ;;  %1119 = vmatpush3.msra.mxu1 %v399_v20  ;;  %v382_v40 = vld [vmem:[%s1381_s15 + $0x58] sm:$0xff]  ;;  %v375_v41 = vld [vmem:[%s1381_s15 + $0x20] sm:$0xff]  ;;  %v384_v44 = vld [vmem:[%s1381_s15 + $0x68] sm:$0xff] }
  0x42   : > { %1012 = vmatprep.subr.mxu0 %v398_v21  ;;  %1104 = vmatprep.subr.mxu1 %v398_v21  ;;  %v383_v42 = vld [vmem:[%s1381_s15 + $0x60] sm:$0xff]  ;;  %v377_v45 = vld [vmem:[%s1381_s15 + $0x30] sm:$0xff]  ;;  %v378_v47 = vld [vmem:[%s1381_s15 + $0x38] sm:$0xff] }
  0x43   : > { %1013 = vmatpush3.msra.mxu0 %v398_v21  ;;  %1120 = vmatpush3.msra.mxu1 %v398_v21  ;;  %v385_v46 = vld [vmem:[%s1381_s15 + $0x70] sm:$0xff]  ;;  %v386_v48 = vld [vmem:[%s1381_s15 + $0x78] sm:$0xff]  ;;  %v356_v49 = vld [vmem:[#allocation2 + $0x8] sm:$0xff] }
  0x44   : > { %1014 = vmatprep.subr.mxu0 %v397_v22  ;;  %1105 = vmatprep.subr.mxu1 %v397_v22  ;;  %v364_v50 = vld [vmem:[#allocation2 + $0x48] sm:$0xff]  ;;  %v355_v53 = vld [vmem:[#allocation2] sm:$0xff]  ;;  %v358_v59 = vld [vmem:[#allocation2 + $0x18] sm:$0xff] }
  0x45   : > { %1015 = vmatpush3.msra.mxu0 %v397_v22  ;;  %1121 = vmatpush3.msra.mxu1 %v397_v22  ;;  %v363_v54 = vld [vmem:[#allocation2 + $0x40] sm:$0xff]  ;;  %v366_v60 = vld [vmem:[#allocation2 + $0x58] sm:$0xff]  ;;  %v357_v1 = vld [vmem:[#allocation2 + $0x10] sm:$0xff] }
  0x46   : > { %1016 = vmatprep.subr.mxu0 %v396_v23  ;;  %1106 = vmatprep.subr.mxu1 %v396_v23  ;;  %v365_v2 = vld [vmem:[#allocation2 + $0x50] sm:$0xff]  ;;  %v360_v7 = vld [vmem:[#allocation2 + $0x28] sm:$0xff]  ;;  %v359_v13 = vld [vmem:[#allocation2 + $0x20] sm:$0xff] }
  0x47   : > { %1017 = vmatpush3.msra.mxu0 %v396_v23  ;;  %1122 = vmatpush3.msra.mxu1 %v396_v23  ;;  %v368_v8 = vld [vmem:[#allocation2 + $0x68] sm:$0xff]  ;;  %v367_v14 = vld [vmem:[#allocation2 + $0x60] sm:$0xff]  ;;  %v362_v19 = vld [vmem:[#allocation2 + $0x38] sm:$0xff] }
  0x48   : > { %1018 = vmatprep.subr.mxu0 %v395_v24  ;;  %1107 = vmatprep.subr.mxu1 %v395_v24  ;;  %v370_v20 = vld [vmem:[#allocation2 + $0x78] sm:$0xff] }
  0x49   : > { %1019 = vmatpush3.msra.mxu0 %v395_v24  ;;  %1123 = vmatpush3.msra.mxu1 %v395_v24 }
  0x4a   : > { %1020 = vmatprep.subr.mxu0 %v394_v25  ;;  %1108 = vmatprep.subr.mxu1 %v394_v25 }
  0x4b   : > { %1021 = vmatpush3.msra.mxu0 %v394_v25  ;;  %1124 = vmatpush3.msra.mxu1 %v394_v25  ;;  %v361_v25 = vld [vmem:[#allocation2 + $0x30] sm:$0xff] }
  0x4c   : > { %1022 = vmatprep.subr.mxu0 %v393_v26  ;;  %1109 = vmatprep.subr.mxu1 %v393_v26 }
  0x4d   : > { %1023 = vmatpush3.msra.mxu0 %v393_v26  ;;  %1125 = vmatpush3.msra.mxu1 %v393_v26  ;;  %v369_v26 = vld [vmem:[#allocation2 + $0x70] sm:$0xff] }
  0x4e   : > { %1024 = vmatprep.subr.mxu0 %v392_v27  ;;  %1110 = vmatprep.subr.mxu1 %v392_v27 }
  0x4f   : > { %1025 = vmatpush3.msra.mxu0 %v392_v27  ;;  %1126 = vmatpush3.msra.mxu1 %v392_v27 }
  0x50   : > { %1026 = vmatprep.subr.mxu0 %v391_v28  ;;  %1111 = vmatprep.subr.mxu1 %v391_v28 }
  0x51   : > { %1027 = vmatpush3.msra.mxu0 %v391_v28  ;;  %1127 = vmatpush3.msra.mxu1 %v391_v28 }
  0x52   : > { %1028 = vmatprep.subr.mxu0 %v390_v29  ;;  %1112 = vmatprep.subr.mxu1 %v390_v29 }
  0x53   : > { %1029 = vmatpush3.msra.mxu0 %v390_v29  ;;  %1128 = vmatpush3.msra.mxu1 %v390_v29 }
  0x54   : > { %1030 = vmatprep.subr.mxu0 %v389_v30  ;;  %1113 = vmatprep.subr.mxu1 %v389_v30 }
  0x55   : > { %1031 = vmatpush3.msra.mxu0 %v389_v30  ;;  %1129 = vmatpush3.msra.mxu1 %v389_v30 }
  0x56   : > { %1032 = vmatprep.subr.mxu0 %v388_v31  ;;  %1114 = vmatprep.subr.mxu1 %v388_v31 }
  0x57   : > { %1033 = vmatpush3.msra.mxu0 %v388_v31  ;;  %1130 = vmatpush3.msra.mxu1 %v388_v31 }
  0x58   : > { %1034 = vmatprep.subr.mxu0 %v387_v32  ;;  %1115 = vmatprep.subr.mxu1 %v387_v32 }
  0x59   : > { %1035 = vmatpush3.msra.mxu0 %v387_v32  ;;  %1131 = vmatpush3.msra.mxu1 %v387_v32 }
  0x5a   : > { %1036 = vmatprep.mubr.f32.mxu0 %v371_v33  ;;  %1048 = vmatprep.mubr.f32.mxu1 %v379_v34 }
  0x5b   : > { %1037 = vmatmul.mubr.f32.vlgmr.msra.gmra.mxu0 %v372_v35  ;;  %1049 = vmatmul.mubr.f32.vlgmr.msra.gmra.mxu1 %v380_v36 }
  0x5c   : > { %1039 = vmatprep.mubr.f32.mxu0 %v373_v37  ;;  %1051 = vmatprep.mubr.f32.mxu1 %v381_v38 }
  0x5f   : > { %1040 = vmatmul.mubr.f32.gmra.mxu0 %v374_v39  ;;  %1052 = vmatmul.mubr.f32.gmra.mxu1 %v382_v40 }
  0x60   : > { %1042 = vmatprep.mubr.f32.mxu0 %v375_v41  ;;  %1054 = vmatprep.mubr.f32.mxu1 %v383_v42 }
  0x63   : > { %1043 = vmatmul.mubr.f32.gmra.mxu0 %v376_v43  ;;  %1055 = vmatmul.mubr.f32.gmra.mxu1 %v384_v44 }
  0x64   : > { %1045 = vmatprep.mubr.f32.mxu0 %v377_v45  ;;  %1057 = vmatprep.mubr.f32.mxu1 %v385_v46 }
  0x67   : > { %1046 = vmatmul.mubr.f32.gmra.mxu0 %v378_v47  ;;  %1058 = vmatmul.mubr.f32.gmra.mxu1 %v386_v48 }
 0x11b   : > { %v1038_v51 = vpop.f32.mrf.mxu0  ;;  %v1050_v52 = vpop.f32.mrf.mxu1 }
 0x11c   : > { %v549_v55 = vadd.f32 %v1038_v51, %v356_v49  ;;  %v557_v56 = vadd.f32 %v1050_v52, %v364_v50 }
 0x11d   : > { %v469_v57 = vpop.f32.mrf.mxu0  ;;  %v509_v58 = vpop.f32.mrf.mxu1 }
 0x11e   : > { %566 = vst.msk [vmem:[#allocation2 + $0x8] sm:$0xff] %vm564_vm1, %v549_v55  ;;  %574 = vst.msk [vmem:[#allocation2 + $0x48] sm:$0xff] %vm564_vm1, %v557_v56  ;;  %v548_v61 = vadd.f32 %v469_v57, %v355_v53  ;;  %v556_v62 = vadd.f32 %v509_v58, %v363_v54 }
 0x11f   : > { %v1041_v63 = vpop.f32.mrf.mxu0  ;;  %v1053_v0 = vpop.f32.mrf.mxu1 }
 0x120   : > { %565 = vst.msk [vmem:[#allocation2] sm:$0xff] %vm564_vm1, %v548_v61  ;;  %573 = vst.msk [vmem:[#allocation2 + $0x40] sm:$0xff] %vm564_vm1, %v556_v62  ;;  %v551_v3 = vadd.f32 %v1041_v63, %v358_v59  ;;  %v559_v4 = vadd.f32 %v1053_v0, %v366_v60 }
 0x121   : > { %v479_v5 = vpop.f32.mrf.mxu0  ;;  %v519_v6 = vpop.f32.mrf.mxu1 }
 0x122   : > { %568 = vst.msk [vmem:[#allocation2 + $0x18] sm:$0xff] %vm564_vm1, %v551_v3  ;;  %576 = vst.msk [vmem:[#allocation2 + $0x58] sm:$0xff] %vm564_vm1, %v559_v4  ;;  %v550_v9 = vadd.f32 %v479_v5, %v357_v1  ;;  %v558_v10 = vadd.f32 %v519_v6, %v365_v2 }
 0x123   : > { %v1044_v11 = vpop.f32.mrf.mxu0  ;;  %v1056_v12 = vpop.f32.mrf.mxu1 }
 0x124   : > { %567 = vst.msk [vmem:[#allocation2 + $0x10] sm:$0xff] %vm564_vm1, %v550_v9  ;;  %575 = vst.msk [vmem:[#allocation2 + $0x50] sm:$0xff] %vm564_vm1, %v558_v10  ;;  %v553_v15 = vadd.f32 %v1044_v11, %v360_v7  ;;  %v561_v16 = vadd.f32 %v1056_v12, %v368_v8 }
 0x125   : > { %v489_v17 = vpop.f32.mrf.mxu0  ;;  %v529_v18 = vpop.f32.mrf.mxu1 }
 0x126   : > { %570 = vst.msk [vmem:[#allocation2 + $0x28] sm:$0xff] %vm564_vm1, %v553_v15  ;;  %578 = vst.msk [vmem:[#allocation2 + $0x68] sm:$0xff] %vm564_vm1, %v561_v16  ;;  %v552_v21 = vadd.f32 %v489_v17, %v359_v13  ;;  %v560_v22 = vadd.f32 %v529_v18, %v367_v14 }
 0x127   : > { %v1047_v23 = vpop.f32.mrf.mxu0  ;;  %v1059_v24 = vpop.f32.mrf.mxu1 }
 0x128   : > { %569 = vst.msk [vmem:[#allocation2 + $0x20] sm:$0xff] %vm564_vm1, %v552_v21  ;;  %577 = vst.msk [vmem:[#allocation2 + $0x60] sm:$0xff] %vm564_vm1, %v560_v22  ;;  %v555_v27 = vadd.f32 %v1047_v23, %v362_v19  ;;  %v563_v28 = vadd.f32 %v1059_v24, %v370_v20  ;;  %584 = sbr.rel (%p928_p13) target bundleno = 529 (0x211), region = 82 }
 0x129   : > { %v499_v29 = vpop.f32.mrf.mxu0  ;;  %v539_v30 = vpop.f32.mrf.mxu1 }
 0x12a   : > { %572 = vst.msk [vmem:[#allocation2 + $0x38] sm:$0xff] %vm564_vm1, %v555_v27  ;;  %580 = vst.msk [vmem:[#allocation2 + $0x78] sm:$0xff] %vm564_vm1, %v563_v28  ;;  %v554_v31 = vadd.f32 %v499_v29, %v361_v25  ;;  %v562_v32 = vadd.f32 %v539_v30, %v369_v26 }
 0x12c   : > { %571 = vst.msk [vmem:[#allocation2 + $0x30] sm:$0xff] %vm564_vm1, %v554_v31  ;;  %579 = vst.msk [vmem:[#allocation2 + $0x70] sm:$0xff] %vm564_vm1, %v562_v32 }
 0x12d   : > { %v608_v33 = vld [vmem:[%s1531_s2 + $0x38] sm:$0xff]  ;;  %v607_v34 = vld [vmem:[%s1531_s2 + $0x30] sm:$0xff]  ;;  %v606_v35 = vld [vmem:[%s1531_s2 + $0x28] sm:$0xff] }
 0x12e   : > { %1060 = vmatprep.subr.mxu0 %v608_v33  ;;  %1132 = vmatprep.subr.mxu1 %v608_v33  ;;  %v605_v36 = vld [vmem:[%s1531_s2 + $0x20] sm:$0xff]  ;;  %v604_v37 = vld [vmem:[%s1531_s2 + $0x18] sm:$0xff]  ;;  %v603_v38 = vld [vmem:[%s1531_s2 + $0x10] sm:$0xff] }
 0x12f   : > { %1061 = vmatpush3.msra.mxu0 %v608_v33  ;;  %1140 = vmatpush3.msra.mxu1 %v608_v33  ;;  %v602_v39 = vld [vmem:[%s1531_s2 + $0x8] sm:$0xff]  ;;  %v601_v40 = vld [vmem:[%s1531_s2] sm:$0xff]  ;;  %v587_v45 = vld [vmem:[#allocation2 + $0x10] sm:$0xff] }
 0x130   : > { %1062 = vmatprep.subr.mxu0 %v607_v34  ;;  %1133 = vmatprep.subr.mxu1 %v607_v34  ;;  %v585_v41 = vld [vmem:[#allocation2] sm:$0xff]  ;;  %v586_v43 = vld [vmem:[#allocation2 + $0x8] sm:$0xff]  ;;  %v595_v46 = vld [vmem:[#allocation2 + $0x50] sm:$0xff] }
 0x131   : > { %1063 = vmatpush3.msra.mxu0 %v607_v34  ;;  %1141 = vmatpush3.msra.mxu1 %v607_v34  ;;  %v593_v42 = vld [vmem:[#allocation2 + $0x40] sm:$0xff]  ;;  %v594_v44 = vld [vmem:[#allocation2 + $0x48] sm:$0xff]  ;;  %v588_v47 = vld [vmem:[#allocation2 + $0x18] sm:$0xff] }
 0x132   : > { %1064 = vmatprep.subr.mxu0 %v606_v35  ;;  %1134 = vmatprep.subr.mxu1 %v606_v35  ;;  %v596_v48 = vld [vmem:[#allocation2 + $0x58] sm:$0xff]  ;;  %v589_v49 = vld [vmem:[#allocation2 + $0x20] sm:$0xff]  ;;  %v590_v51 = vld [vmem:[#allocation2 + $0x28] sm:$0xff] }
 0x133   : > { %1065 = vmatpush3.msra.mxu0 %v606_v35  ;;  %1142 = vmatpush3.msra.mxu1 %v606_v35  ;;  %v597_v50 = vld [vmem:[#allocation2 + $0x60] sm:$0xff]  ;;  %v598_v52 = vld [vmem:[#allocation2 + $0x68] sm:$0xff]  ;;  %v591_v53 = vld [vmem:[#allocation2 + $0x30] sm:$0xff] }
 0x134   : > { %1066 = vmatprep.subr.mxu0 %v605_v36  ;;  %1135 = vmatprep.subr.mxu1 %v605_v36  ;;  %v599_v54 = vld [vmem:[#allocation2 + $0x70] sm:$0xff]  ;;  %v592_v55 = vld [vmem:[#allocation2 + $0x38] sm:$0xff]  ;;  %v929_v57 = vld [vmem:[%s1532_s3] ss:$0 sm:$0xff] }
 0x135   : > { %1067 = vmatpush3.msra.mxu0 %v605_v36  ;;  %1143 = vmatpush3.msra.mxu1 %v605_v36  ;;  %v600_v56 = vld [vmem:[#allocation2 + $0x78] sm:$0xff] }
 0x136   : > { %1068 = vmatprep.subr.mxu0 %v604_v37  ;;  %1136 = vmatprep.subr.mxu1 %v604_v37 }
 0x137   : > { %1069 = vmatpush3.msra.mxu0 %v604_v37  ;;  %1144 = vmatpush3.msra.mxu1 %v604_v37 }
 0x138   : > { %1070 = vmatprep.subr.mxu0 %v603_v38  ;;  %1137 = vmatprep.subr.mxu1 %v603_v38 }
 0x139   : > { %1071 = vmatpush3.msra.mxu0 %v603_v38  ;;  %1145 = vmatpush3.msra.mxu1 %v603_v38 }
 0x13a   : > { %1072 = vmatprep.subr.mxu0 %v602_v39  ;;  %1138 = vmatprep.subr.mxu1 %v602_v39 }
 0x13b   : > { %1073 = vmatpush3.msra.mxu0 %v602_v39  ;;  %1146 = vmatpush3.msra.mxu1 %v602_v39 }
 0x13c   : > { %1074 = vmatprep.subr.mxu0 %v601_v40  ;;  %1139 = vmatprep.subr.mxu1 %v601_v40 }
 0x13d   : > { %1075 = vmatpush3.msra.mxu0 %v601_v40  ;;  %1147 = vmatpush3.msra.mxu1 %v601_v40 }
 0x13e   : > { %1076 = vmatprep.mubr.msk.f32.mxu0 %vm564_vm1, %v585_v41  ;;  %1088 = vmatprep.mubr.msk.f32.mxu1 %vm564_vm1, %v593_v42 }
 0x13f   : > { %1077 = vmatmul.mubr.msk.f32.vlgmr.msra.gmra.mxu0 %vm564_vm1, %v586_v43  ;;  %1089 = vmatmul.mubr.msk.f32.vlgmr.msra.gmra.mxu1 %vm564_vm1, %v594_v44 }
 0x140   : > { %1079 = vmatprep.mubr.msk.f32.mxu0 %vm564_vm1, %v587_v45  ;;  %1091 = vmatprep.mubr.msk.f32.mxu1 %vm564_vm1, %v595_v46 }
 0x143   : > { %1080 = vmatmul.mubr.msk.f32.gmra.mxu0 %vm564_vm1, %v588_v47  ;;  %1092 = vmatmul.mubr.msk.f32.gmra.mxu1 %vm564_vm1, %v596_v48 }
 0x144   : > { %1082 = vmatprep.mubr.msk.f32.mxu0 %vm564_vm1, %v589_v49  ;;  %1094 = vmatprep.mubr.msk.f32.mxu1 %vm564_vm1, %v597_v50 }
 0x147   : > { %1083 = vmatmul.mubr.msk.f32.gmra.mxu0 %vm564_vm1, %v590_v51  ;;  %1095 = vmatmul.mubr.msk.f32.gmra.mxu1 %vm564_vm1, %v598_v52 }
 0x148   : > { %1085 = vmatprep.mubr.msk.f32.mxu0 %vm564_vm1, %v591_v53  ;;  %1097 = vmatprep.mubr.msk.f32.mxu1 %vm564_vm1, %v599_v54 }
 0x14b   : > { %1086 = vmatmul.mubr.msk.f32.gmra.mxu0 %vm564_vm1, %v592_v55  ;;  %1098 = vmatmul.mubr.msk.f32.gmra.mxu1 %vm564_vm1, %v600_v56 }
 0x1ff   : > { %v1078_v58 = vpop.f32.mrf.mxu0  ;;  %v1090_v59 = vpop.f32.mrf.mxu1 }
 0x200   : > { %v736_v60 = vadd.f32 %v1078_v58, %v929_v57  ;;  %v776_v61 = vadd.f32 %v1090_v59, %v929_v57 }
 0x201   : > { %v730_v62 = vpop.f32.mrf.mxu0  ;;  %v770_v63 = vpop.f32.mrf.mxu1 }
 0x202   : > { %810 = vst [vmem:[%s1379_s7 + $0x8] sm:$0xff] %v736_v60  ;;  %818 = vst [vmem:[%s1379_s7 + $0x48] sm:$0xff] %v776_v61  ;;  %v731_v0 = vadd.f32 %v929_v57, %v730_v62  ;;  %v771_v1 = vadd.f32 %v929_v57, %v770_v63 }
 0x203   : > { %v1081_v2 = vpop.f32.mrf.mxu0  ;;  %v1093_v3 = vpop.f32.mrf.mxu1 }
 0x204   : > { %809 = vst [vmem:[%s1379_s7] sm:$0xff] %v731_v0  ;;  %817 = vst [vmem:[%s1379_s7 + $0x40] sm:$0xff] %v771_v1  ;;  %v746_v4 = vadd.f32 %v1081_v2, %v929_v57  ;;  %v786_v5 = vadd.f32 %v1093_v3, %v929_v57 }
 0x205   : > { %v740_v6 = vpop.f32.mrf.mxu0  ;;  %v780_v7 = vpop.f32.mrf.mxu1 }
 0x206   : > { %812 = vst [vmem:[%s1379_s7 + $0x18] sm:$0xff] %v746_v4  ;;  %820 = vst [vmem:[%s1379_s7 + $0x58] sm:$0xff] %v786_v5  ;;  %v741_v8 = vadd.f32 %v929_v57, %v740_v6  ;;  %v781_v9 = vadd.f32 %v929_v57, %v780_v7 }
 0x207   : > { %v1084_v10 = vpop.f32.mrf.mxu0  ;;  %v1096_v11 = vpop.f32.mrf.mxu1 }
 0x208   : > { %811 = vst [vmem:[%s1379_s7 + $0x10] sm:$0xff] %v741_v8  ;;  %819 = vst [vmem:[%s1379_s7 + $0x50] sm:$0xff] %v781_v9  ;;  %v756_v12 = vadd.f32 %v1084_v10, %v929_v57  ;;  %v796_v13 = vadd.f32 %v1096_v11, %v929_v57 }
 0x209   : > { %v750_v14 = vpop.f32.mrf.mxu0  ;;  %v790_v15 = vpop.f32.mrf.mxu1 }
 0x20a   : > { %814 = vst [vmem:[%s1379_s7 + $0x28] sm:$0xff] %v756_v12  ;;  %822 = vst [vmem:[%s1379_s7 + $0x68] sm:$0xff] %v796_v13  ;;  %v751_v16 = vadd.f32 %v929_v57, %v750_v14  ;;  %v791_v17 = vadd.f32 %v929_v57, %v790_v15 }
 0x20b   : > { %v1087_v18 = vpop.f32.mrf.mxu0  ;;  %v1099_v19 = vpop.f32.mrf.mxu1 }
 0x20c   : > { %813 = vst [vmem:[%s1379_s7 + $0x20] sm:$0xff] %v751_v16  ;;  %821 = vst [vmem:[%s1379_s7 + $0x60] sm:$0xff] %v791_v17  ;;  %v766_v20 = vadd.f32 %v1087_v18, %v929_v57  ;;  %v806_v21 = vadd.f32 %v1099_v19, %v929_v57 }
 0x20d   : > { %v760_v22 = vpop.f32.mrf.mxu0  ;;  %v800_v23 = vpop.f32.mrf.mxu1 }
 0x20e   : > { %816 = vst [vmem:[%s1379_s7 + $0x38] sm:$0xff] %v766_v20  ;;  %824 = vst [vmem:[%s1379_s7 + $0x78] sm:$0xff] %v806_v21  ;;  %v761_v24 = vadd.f32 %v929_v57, %v760_v22  ;;  %v801_v25 = vadd.f32 %v929_v57, %v800_v23 }
 0x210   : > { %815 = vst [vmem:[%s1379_s7 + $0x30] sm:$0xff] %v761_v24  ;;  %823 = vst [vmem:[%s1379_s7 + $0x70] sm:$0xff] %v801_v25 }
 0x211 PF: > { %s14_s21 = sadd.s32 1, %s1260_s21   ;;  %s1534_s15 = smov %s1240_s16 }
 0x212   : > { %p11_p0 = scmp.ge.s32.totalorder %s14_s21, 27   ;;  %s1535_s16 = smov %s1339_s28 }
 0x213   : > { %s1536_s17 = smov %s1252_s19  ;;  %s1537_s18 = smov %s1256_s20 }
 0x214   : > { %s1538_s19 = smov %s1541_s22  ;;  %s1539_s20 = smov %s1545_s23 }
 0x215   :  { %13 = sbr.rel (!%p11_p0) target bundleno = 4 (0x4), region = 120 }

</bundles_post_ra>
